<compile_context>
chip_gen: v7x
topology: tpu7x:2x2x1
jax: 0.10.0
libtpu: 0.0.40
codegen_flags: <defaults>
</compile_context>

<pallas_src>
import math

import numpy as np

import jax
import jax.numpy as jnp
from jax.experimental import pallas as pl
from jax.experimental.pallas import tpu as pltpu


def _round_up(x, m):
    return ((x + m - 1) // m) * m


def _make_kernel(tn, m_pad, w, n, needs_row_mask):
    two_pi = 2.0 * math.pi
    inv_two_pi = 1.0 / two_pi

    def wrap(d):
        # Wrap to [-pi, pi).  Same squared value as atan2(sin d, cos d); only
        # the d == pi boundary differs (maps to -pi), which squares equally.
        return d - two_pi * jnp.floor((d + math.pi) * inv_two_pi)

    def kernel(w_ref, p_ref, out_ref):
        p = p_ref[...].astype(jnp.float32)                    # (tn, m_pad)

        if needs_row_mask:
            # Only emitted when tn does not divide n: zero the unspecified
            # tail rows of the last partial block BEFORE any arithmetic so
            # garbage (possibly NaN/Inf) never reaches the reduction.
            row = jax.lax.broadcasted_iota(jnp.int32, (tn, m_pad), 0)
            limit = n - pl.program_id(0) * tn
            p = jnp.where(row < limit, p, 0.0)

        # Right neighbour (col + 1) and bottom neighbour (flat + w) via XLU
        # lane rotations; wrap-around / padded lanes carry zero weight.
        right = pltpu.roll(p, shift=m_pad - 1, axis=1)        # p[k + 1]
        below = pltpu.roll(p, shift=m_pad - w, axis=1)        # p[k + w]

        dx = wrap(p - right)
        dy = wrap(p - below)

        # Precomputed resident weights: masks and mean denominators folded in.
        wx = w_ref[0:1, :]                                    # (1, m_pad)
        wy = w_ref[1:2, :]                                    # (1, m_pad)

        # Single fused reduction per tile.
        partial = jnp.sum(dx * dx * wx + dy * dy * wy)
        out_ref[...] = jnp.full(out_ref.shape, partial, dtype=jnp.float32)

    return kernel


@jax.jit
def phase_continuity_loss(phase):
    """Scalar phase-continuity loss; matches PhaseContinuityLoss.forward."""
    b, c, h, w = phase.shape
    n = b * c
    m = h * w

    if h < 2 or w < 2:
        # torch.mean over an empty diff tensor is NaN.
        return jnp.float32(float("nan"))

    inv_nx = 1.0 / float(n * h * (w - 1))
    inv_ny = 1.0 / float(n * (h - 1) * w)

    p = phase.reshape(n, m)                    # free reshape, native dtype

    # Lane-align the flattened spatial axis so the rolls stay vreg-aligned.
    m_pad = _round_up(m, 128)
    if m_pad != m:
        # TODO(synk): this lane pad is one extra HBM copy; only hit when
        # h*w is not already a multiple of 128.
        p = jnp.pad(p, ((0, 0), (0, m_pad - m)))

    # Grid-invariant per-lane weights, computed at trace time (numpy) and
    # baked in as a (2, m_pad) f32 constant: row 0 = wx, row 1 = wy.
    k = np.arange(m_pad)
    wx = np.where(((k % w) != (w - 1)) & (k < m), inv_nx, 0.0)
    wy = np.where(k < (h - 1) * w, inv_ny, 0.0)
    weights = jnp.asarray(np.stack([wx, wy]).astype(np.float32))

    # Row tile: ~1 MiB f32-equivalent per input block (fits every generation's
    # scoped-VMEM budget, including v7x's 64 MiB VMEM, with room for the f32
    # cast, two rolled copies, dx/dy and double buffering), aligned to the
    # dtype sublane pack.
    pack = {1: 32, 2: 16, 4: 8}.get(phase.dtype.itemsize, 8)
    target_f32_bytes = 1 << 20
    rows = max(pack, ((target_f32_bytes // (m_pad * 4)) // pack) * pack)
    if rows >= n:
        if n >= 2 * pack:
            # Keep >=2 grid tiles so a v7x megacore can shard the parallel axis.
            tn = _round_up((n + 1) // 2, pack)
        else:
            tn = n                              # single full-extent block
    else:
        tn = rows
    num_tiles = pl.cdiv(n, tn)
    needs_row_mask = (n % tn) != 0
    # TODO(synk): for very large h*w (a single pack-row block of many MiB) a
    # second grid axis over lanes with a one-row halo would be needed; not
    # required at these sizes.

    partials = pl.pallas_call(
        _make_kernel(tn, m_pad, w, n, needs_row_mask),
        grid=(num_tiles,),
        in_specs=[pl.BlockSpec((2, m_pad), lambda i: (0, 0)),     # weights
                  pl.BlockSpec((tn, m_pad), lambda i: (i, 0))],   # phase rows
        out_specs=pl.BlockSpec((1, 8, 128), lambda i: (i, 0, 0)),
        out_shape=jax.ShapeDtypeStruct((num_tiles, 8, 128), jnp.float32),
        compiler_params=pltpu.CompilerParams(
            dimension_semantics=("parallel",),
            vmem_limit_bytes=32 * 1024 * 1024),
        cost_estimate=pl.CostEstimate(
            flops=20 * n * m_pad,
            transcendentals=0,
            bytes_accessed=int(n * m_pad * phase.dtype.itemsize
                               + weights.size * 4
                               + num_tiles * 8 * 128 * 4)),
    )(weights, p)

    # Tiny cross-tile reduction + final 0.5 scaling outside the kernel so the
    # grid axis stays embarrassingly parallel (v7x megacore friendly).
    return 0.5 * jnp.sum(partials[:, 0, 0])


def _reference(phase):
    # Pure-JAX reference mirroring the torch module exactly.
    dx = phase[:, :, :, :-1] - phase[:, :, :, 1:]
    dy = phase[:, :, :-1, :] - phase[:, :, 1:, :]
    dx = jnp.arctan2(jnp.sin(dx), jnp.cos(dx))
    dy = jnp.arctan2(jnp.sin(dy), jnp.cos(dy))
    return 0.5 * (jnp.mean(dx ** 2) + jnp.mean(dy ** 2))


if __name__ == "__main__":
    key = jax.random.PRNGKey(0)
    # Values span multiple periods so the wrapping actually matters.
    phase = jax.random.uniform(
        key, (2, 4, 16, 16), jnp.float32,
        minval=-2.0 * math.pi, maxval=2.0 * math.pi)

    loss = jax.block_until_ready(phase_continuity_loss(phase))

    ref = _reference(phase)
    assert jnp.allclose(loss, ref, rtol=1e-4, atol=1e-5), (float(loss), float(ref))
    print("KERNEL_OK")
</pallas_src>

<mosaic_0001>
module attributes {stable_mosaic.version = 11 : i64} {
  func.func @kernel(%arg0: i32, %arg1: memref<2x256xf32, #tpu.memory_space<vmem>>, %arg2: memref<8x256xf32, #tpu.memory_space<vmem>>, %arg3: memref<1x8x128xf32, #tpu.memory_space<vmem>>) attributes {dimension_semantics = [#tpu.dimension_semantics<parallel>], iteration_bounds = array<i64: 1>, scalar_prefetch = 0 : i64, scratch_operands = 0 : i64, tpu.core_type = #tpu.core_type<tc>, window_params = [{pipeline_mode = #tpu.pipeline_mode<synchronous>, transform_indices = @transform_0, window_bounds = array<i64: 2, 256>}, {transform_indices = @transform_1, window_bounds = array<i64: 8, 256>}, {transform_indices = @transform_2, window_bounds = array<i64: 1, 8, 128>}]} {
    %c0 = arith.constant 0 : index
    %c0_0 = arith.constant 0 : index
    %0 = vector.load %arg2[%c0, %c0_0] : memref<8x256xf32, #tpu.memory_space<vmem>>, vector<8x256xf32>
    %c255_i32 = arith.constant 255 : i32
    %1 = tpu.dynamic_rotate %0 by %c255_i32 dim 1 : vector<8x256xf32>, i32 -> vector<8x256xf32>
    %c240_i32 = arith.constant 240 : i32
    %2 = tpu.dynamic_rotate %0 by %c240_i32 dim 1 : vector<8x256xf32>, i32 -> vector<8x256xf32>
    %3 = arith.subf %0, %1 : vector<8x256xf32>
    %cst = arith.constant 3.14159274 : f32
    %4 = vector.broadcast %cst : f32 to vector<8x256xf32>
    %5 = arith.addf %3, %4 : vector<8x256xf32>
    %cst_1 = arith.constant 0.159154937 : f32
    %6 = vector.broadcast %cst_1 : f32 to vector<8x256xf32>
    %7 = arith.mulf %5, %6 : vector<8x256xf32>
    %8 = math.floor %7 : vector<8x256xf32>
    %cst_2 = arith.constant 6.28318548 : f32
    %9 = vector.broadcast %cst_2 : f32 to vector<8x256xf32>
    %10 = arith.mulf %9, %8 : vector<8x256xf32>
    %11 = arith.subf %3, %10 : vector<8x256xf32>
    %12 = arith.subf %0, %2 : vector<8x256xf32>
    %cst_3 = arith.constant 3.14159274 : f32
    %13 = vector.broadcast %cst_3 : f32 to vector<8x256xf32>
    %14 = arith.addf %12, %13 : vector<8x256xf32>
    %cst_4 = arith.constant 0.159154937 : f32
    %15 = vector.broadcast %cst_4 : f32 to vector<8x256xf32>
    %16 = arith.mulf %14, %15 : vector<8x256xf32>
    %17 = math.floor %16 : vector<8x256xf32>
    %cst_5 = arith.constant 6.28318548 : f32
    %18 = vector.broadcast %cst_5 : f32 to vector<8x256xf32>
    %19 = arith.mulf %18, %17 : vector<8x256xf32>
    %20 = arith.subf %12, %19 : vector<8x256xf32>
    %c0_6 = arith.constant 0 : index
    %c0_7 = arith.constant 0 : index
    %21 = vector.load %arg1[%c0_6, %c0_7] : memref<2x256xf32, #tpu.memory_space<vmem>>, vector<1x256xf32>
    %c1 = arith.constant 1 : index
    %c0_8 = arith.constant 0 : index
    %22 = vector.load %arg1[%c1, %c0_8] : memref<2x256xf32, #tpu.memory_space<vmem>>, vector<1x256xf32>
    %23 = arith.mulf %11, %11 : vector<8x256xf32>
    %24 = vector.broadcast %21 : vector<1x256xf32> to vector<8x256xf32>
    %25 = arith.mulf %23, %24 : vector<8x256xf32>
    %26 = arith.mulf %20, %20 : vector<8x256xf32>
    %27 = vector.broadcast %22 : vector<1x256xf32> to vector<8x256xf32>
    %28 = arith.mulf %26, %27 : vector<8x256xf32>
    %29 = arith.addf %25, %28 : vector<8x256xf32>
    %30 = vector.shape_cast %29 : vector<8x256xf32> to vector<1x8x256xf32>
    %cst_9 = arith.constant dense<0.000000e+00> : vector<1xf32>
    %31 = vector.multi_reduction <add>, %30, %cst_9 [1, 2] : vector<1x8x256xf32> to vector<1xf32>
    %32 = vector.shape_cast %31 : vector<1xf32> to vector<1x1x1xf32>
    %33 = vector.extract %32[0, 0, 0] : f32 from vector<1x1x1xf32>
    %34 = vector.broadcast %33 : f32 to vector<1x8x128xf32>
    %c0_10 = arith.constant 0 : index
    %c0_11 = arith.constant 0 : index
    %c0_12 = arith.constant 0 : index
    %35 = vector.load %arg3[%c0_10, %c0_11, %c0_12] : memref<1x8x128xf32, #tpu.memory_space<vmem>>, vector<1x8x128xf32>
    tpu.vector_store %arg3[%c0_10, %c0_11, %c0_12], %34 {strides = array<i32>} : memref<1x8x128xf32, #tpu.memory_space<vmem>>, vector<1x8x128xf32>,
    return
  }
  func.func @transform_0(%arg0: i32) -> (i32, i32) {
    %c0_i32 = arith.constant 0 : i32
    %c0_i32_0 = arith.constant 0 : i32
    %c0_i32_1 = arith.constant 0 : i32
    return %c0_i32, %c0_i32_0 : i32, i32
  }
  func.func @transform_1(%arg0: i32) -> (i32, i32) {
    %c0_i32 = arith.constant 0 : i32
    %c0_i32_0 = arith.constant 0 : i32
    return %arg0, %c0_i32 : i32, i32
  }
  func.func @transform_2(%arg0: i32) -> (i32, i32, i32) {
    %c0_i32 = arith.constant 0 : i32
    %c0_i32_0 = arith.constant 0 : i32
    %c0_i32_1 = arith.constant 0 : i32
    return %arg0, %c0_i32, %c0_i32_0 : i32, i32, i32
  }
}

</mosaic_0001>

<bundles_post_ra>
// kernel: phase_continuity_loss.1
= control target key start
LH: loop header
LB: loop body
LE: loop exit
PB: predicated region body
PF: predicated region fallthrough
CT: control target
= control target key end

     0   :  { %s109_s11 = smov 112   ;;  %s110_s12 = smov 127   ;;  %v17_v2 = vlaneseq  ;;  %s141_s1 = inlined_call_operand.vmem [shape: f32[8,256], index: 1, kind: input, shape index: {}]   ;;  %s142_s0 = inlined_call_operand.vmem [shape: f32[2,256], index: 0, kind: input, shape index: {}]   ;;  %s143_s2 = inlined_call_operand.vmem [shape: f32[1,8,128], index: 2, kind: output, shape index: {}]  }
   0x1   :  { %v11_v0 = vld [vmem:[%s141_s1] sm:$0xff]  ;;  %v12_v1 = vld [vmem:[%s141_s1 + $0x8] sm:$0xff] }
   0x2   :  { %22 = vrot.lane.b32.xlu1 %v11_v0, %s109_s11  ;;  %13 = vrot.lane.b32.xlu0 %v11_v0, %s110_s12  ;;  %v18_v3 = vand.u32 127, %v17_v2  ;;  %v60_v16 = vshrl.u32 %v17_v2, 7  ;;  %v53_v30 = vld [vmem:[%s142_s0] ss:$2 sm:$0x3] }
   0x3   :  { %v104_v31 = vld [vmem:[%s142_s0 + $0x1] ss:$2 sm:$0x3] }
   0x4   :  { %vm26_vm0 = vcmp.lt.s32.totalorder %v18_v3, 112  ;;  %vm19_vm1 = vcmp.lt.s32.totalorder %v18_v3, 127  ;;  %v61_v25 = vsub.s32 0, %v60_v16  ;;  %v65_v26 = vsub.s32 1, %v60_v16 }
   0x6   :  { %24 = vrot.lane.b32.xlu1 %v12_v1, %s109_s11  ;;  %15 = vrot.lane.b32.xlu0 %v12_v1, %s110_s12  ;;  %v62_v37 = vrot.slane %v53_v30, %v61_v25  ;;  %v77_v38 = vrot.slane %v104_v31, %v61_v25  ;;  %v81_v42 = vrot.slane %v104_v31, %v65_v26 }
   0x7   :  { %v66_v44 = vrot.slane %v53_v30, %v65_v26 }
  0x74   :  { %v23_v4 = vpop.permute.xlu1 %22  ;;  %v14_v5 = vpop.permute.xlu0 %13 }
  0x78   :  { %v25_v6 = vpop.permute.xlu1 %24  ;;  %v16_v7 = vpop.permute.xlu0 %15 }
  0x79   :  { %v27_v8 = vsel %vm26_vm0, %v23_v4, %v25_v6  ;;  %v28_v9 = vsel %vm26_vm0, %v25_v6, %v23_v4  ;;  %v20_v10 = vsel %vm19_vm1, %v14_v5, %v16_v7  ;;  %v21_v11 = vsel %vm19_vm1, %v16_v7, %v14_v5 }
  0x7a   :  { %v41_v12 = vsub.f32 %v11_v0, %v27_v8  ;;  %v42_v13 = vsub.f32 %v12_v1, %v28_v9  ;;  %v29_v14 = vsub.f32 %v11_v0, %v20_v10  ;;  %v30_v15 = vsub.f32 %v12_v1, %v21_v11 }
  0x7c   :  { %v43_v17 = vadd.f32 3.1415927, %v41_v12  ;;  %v44_v18 = vadd.f32 3.1415927, %v42_v13  ;;  %v31_v19 = vadd.f32 3.1415927, %v29_v14 }
  0x7d   :  { %v32_v20 = vadd.f32 3.1415927, %v30_v15 }
  0x7e   :  { %v45_v21 = vmul.f32 0.15915494, %v43_v17  ;;  %v46_v22 = vmul.f32 0.15915494, %v44_v18  ;;  %v33_v23 = vmul.f32 0.15915494, %v31_v19 }
  0x7f   :  { %v34_v24 = vmul.f32 0.15915494, %v32_v20 }
  0x80   :  { %v47_v27 = vfloor.f32 %v45_v21  ;;  %v48_v28 = vfloor.f32 %v46_v22  ;;  %v35_v29 = vfloor.f32 %v33_v23 }
  0x81   :  { %v36_v32 = vfloor.f32 %v34_v24 }
  0x82   :  { %v49_v33 = vmul.f32 6.2831855, %v47_v27  ;;  %v50_v34 = vmul.f32 6.2831855, %v48_v28  ;;  %v37_v35 = vmul.f32 6.2831855, %v35_v29 }
  0x83   :  { %v38_v36 = vmul.f32 6.2831855, %v36_v32 }
  0x84   :  { %v51_v39 = vsub.f32 %v41_v12, %v49_v33  ;;  %v52_v40 = vsub.f32 %v42_v13, %v50_v34  ;;  %v39_v41 = vsub.f32 %v29_v14, %v37_v35 }
  0x85   :  { %v40_v43 = vsub.f32 %v30_v15, %v38_v36 }
  0x86   :  { %v71_v45 = vmul.f32 %v51_v39, %v51_v39  ;;  %v72_v46 = vmul.f32 %v52_v40, %v52_v40  ;;  %v56_v47 = vmul.f32 %v39_v41, %v39_v41 }
  0x87   :  { %v57_v48 = vmul.f32 %v40_v43, %v40_v43 }
  0x88   :  { %v69_v49 = vmul.f32 %v62_v37, %v56_v47  ;;  %v84_v50 = vmul.f32 %v77_v38, %v71_v45  ;;  %v85_v51 = vmul.f32 %v81_v42, %v72_v46 }
  0x89   :  { %v70_v52 = vmul.f32 %v66_v44, %v57_v48 }
  0x8a   :  { %v86_v53 = vadd.f32 %v84_v50, %v69_v49 }
  0x8b   :  { %v87_v54 = vadd.f32 %v85_v51, %v70_v52 }
  0x8d   :  { %v88_v55 = vadd.f32 %v87_v54, %v86_v53 }
  0x8f   :  { %89 = vadd.xlane.f32.xlu0 %v88_v55 }
 0x11c   :  { %v90_v56 = vpop.xlane.xlu0 %89 }
 0x11d   :  { %v91_v57 = vrot.slane %v90_v56, 4 }
 0x11f   :  { %v92_v58 = vadd.f32 %v91_v57, %v90_v56 }
 0x121   :  { %v93_v59 = vrot.slane %v92_v58, 2 }
 0x123   :  { %v94_v60 = vadd.f32 %v93_v59, %v92_v58 }
 0x125   :  { %v95_v61 = vrot.slane %v94_v60, 1 }
 0x127   :  { %v96_v62 = vadd.f32 %v95_v61, %v94_v60 }
 0x129   :  { %105 = vpush %v96_v62 }
 0x15a   :  { %s106_s0 = spop %105 }
 0x15b   :  { %v98_v63 = vstv %s106_s0 }
 0x15c   :  { %99 = vst [vmem:[%s143_s2] sm:$0xff] %v98_v63 }

</bundles_post_ra>
